<compile_context>
chip_gen: v5e
topology: v5e:2x2
jax: 0.10.0
libtpu: 0.0.40
codegen_flags: <defaults>
</compile_context>

<pallas_src>
import jax
import jax.numpy as jnp
from jax import lax
from jax.experimental import pallas as pl
from jax.experimental.pallas import tpu as pltpu

NEG_SLOPE = 0.01  # nn.LeakyReLU() default negative_slope


def _leaky_relu(x):
    # max(x, a*x) == LeakyReLU(x) for 0 < a < 1: one mul + one max (VPU).
    return jnp.maximum(x, NEG_SLOPE * x)


def _round_up(x, m):
    return ((x + m - 1) // m) * m


def discriminator_kernel(x_ref, w1_ref, b1_ref, w2_ref, b2_ref, w3_ref,
                         b3_ref, out_ref):
    """One batch tile. x arrives (TILE_B, IN); activations are (H, TILE_B)."""
    x = x_ref[...].astype(jnp.bfloat16)                               # (TB, IN)

    # fc1 + LeakyReLU: contract IN on both operands -> (H, TB) with batch on
    # lanes (w1 kept in the torch (out_features, in_features) layout).
    h1 = lax.dot_general(w1_ref[...], x,
                         dimension_numbers=(((1,), (1,)), ((), ())),
                         preferred_element_type=jnp.float32)          # (H, TB)
    h1 = _leaky_relu(h1 + b1_ref[...])                                # bias (H, 1)

    # fc2 + LeakyReLU (cast activation back to bf16 for the MXU, f32 acc).
    h2 = jnp.dot(w2_ref[...], h1.astype(jnp.bfloat16),
                 preferred_element_type=jnp.float32)                  # (H, TB)
    h2 = _leaky_relu(h2 + b2_ref[...])

    # fc3: out_features == 1 -> broadcast-mul + sublane reduce instead of an
    # N=1 MXU matmul.  Result is already a lane-dense (1, TB) row.
    y = jnp.sum(h2 * w3_ref[...].astype(jnp.float32), axis=0,
                keepdims=True) + b3_ref[0]
    out_ref[...] = y.astype(out_ref.dtype)


def _choose_tile_b(B):
    b128 = _round_up(max(B, 1), 128)
    if b128 <= 128:
        return 128
    # Largest tile in {512, 384, 256, 128} that (a) divides the 128-rounded
    # batch (no extra last-tile padding on an input-bound kernel) and
    # (b) leaves >= 2 grid steps so v7x's second TensorCore gets work.
    # Kept <= 512: on v5e the binding constraint is VMEM headroom, not tile N.
    for t in (512, 384, 256, 128):
        if b128 % t == 0 and b128 // t >= 2:
            return t
    return 128


def _vmem_limit_bytes(in_dim, h_pad, tile_b):
    weights = (h_pad * in_dim * 2        # w1 bf16 (single-buffered)
               + h_pad * h_pad * 2       # w2 bf16
               + h_pad * 2               # w3 bf16
               + 2 * h_pad * 4)          # b1, b2 f32
    stream = 2 * tile_b * in_dim * 4 + 2 * tile_b * 4   # x (2 bufs) + out (2 bufs)
    interm = 3 * h_pad * tile_b * 4 + h_pad * tile_b * 2  # h1/h2 f32 + bf16 copy
    total = int((weights + stream + interm) * 1.3) + (2 << 20)
    return max(32 << 20, min(total, 128 << 20))


def discriminator_forward(x, params, *, tile_b=None, interpret=False):
    """x: (B, in_dim) float32.  Returns (B, 1) float32."""
    w1, b1 = params["w1"], params["b1"]   # (H_pad, in_dim) bf16, (H_pad, 1) f32
    w2, b2 = params["w2"], params["b2"]   # (H_pad, H_pad) bf16, (H_pad, 1) f32
    w3, b3 = params["w3"], params["b3"]   # (H_pad, 1) bf16,     (1,) f32

    B, in_dim = x.shape
    h_pad = w1.shape[0]

    if tile_b is None:
        tile_b = _choose_tile_b(B)
    tile_b = _round_up(tile_b, 128)                 # lane-dense tiles
    b_pad = _round_up(max(B, 1), tile_b)
    nb = b_pad // tile_b

    # x streams in its natural layout; only pad the batch rows when needed
    # (zero rows produce bias-derived garbage that is sliced off below).
    if b_pad != B:
        x = jnp.pad(x, ((0, b_pad - B), (0, 0)))

    resident = dict(pipeline_mode=pl.Buffered(1))   # fetched once, no dbl-buf

    out = pl.pallas_call(
        discriminator_kernel,
        out_shape=jax.ShapeDtypeStruct((1, b_pad), jnp.float32),
        grid=(nb,),
        in_specs=[
            pl.BlockSpec((tile_b, in_dim), lambda i: (i, 0)),             # x: streamed
            pl.BlockSpec((h_pad, in_dim), lambda i: (0, 0), **resident),  # w1
            pl.BlockSpec((h_pad, 1), lambda i: (0, 0), **resident),       # b1
            pl.BlockSpec((h_pad, h_pad), lambda i: (0, 0), **resident),   # w2
            pl.BlockSpec((h_pad, 1), lambda i: (0, 0), **resident),       # b2
            pl.BlockSpec((h_pad, 1), lambda i: (0, 0), **resident),       # w3 (col)
            pl.BlockSpec(memory_space=pltpu.MemorySpace.SMEM),            # b3 scalar
        ],
        out_specs=pl.BlockSpec((1, tile_b), lambda i: (0, i)),
        compiler_params=pltpu.CompilerParams(
            dimension_semantics=("parallel",),
            vmem_limit_bytes=_vmem_limit_bytes(in_dim, h_pad, tile_b)),
        interpret=interpret,
    )(x, w1, b1, w2, b2, w3, b3)

    return out[0, :B].reshape(B, 1)


# ----------------------------------------------------------------------------
# Parameter init (matches torch: xavier_normal_ weights, zero biases)
# ----------------------------------------------------------------------------
def _xavier_normal(key, shape, fan_in, fan_out):
    std = (2.0 / (fan_in + fan_out)) ** 0.5
    return std * jax.random.normal(key, shape, dtype=jnp.float32)


def init_params(key, in_dim):
    """Kernel params (hidden zero-padded to 128 lanes, bf16 matmul weights)
    plus unpadded f32 copies for the pure-JAX reference."""
    k1, k2, k3 = jax.random.split(key, 3)
    h = in_dim * 2
    h_pad = _round_up(h, 128)

    w1 = _xavier_normal(k1, (h, in_dim), in_dim, h)   # fc1.weight (out, in)
    w2 = _xavier_normal(k2, (h, h), h, h)             # fc2.weight
    w3 = _xavier_normal(k3, (1, h), h, 1)             # fc3.weight

    params = {
        "w1": jnp.pad(w1, ((0, h_pad - h), (0, 0))).astype(jnp.bfloat16),
        "b1": jnp.zeros((h_pad, 1), jnp.float32),
        "w2": jnp.pad(w2, ((0, h_pad - h), (0, h_pad - h))).astype(jnp.bfloat16),
        "b2": jnp.zeros((h_pad, 1), jnp.float32),
        "w3": jnp.pad(w3.T, ((0, h_pad - h), (0, 0))).astype(jnp.bfloat16),
        "b3": jnp.zeros((1,), jnp.float32),
    }
    ref = {
        "w1": w1, "w2": w2, "w3": w3,
        "b1": jnp.zeros((h,), jnp.float32),
        "b2": jnp.zeros((h,), jnp.float32),
        "b3": jnp.zeros((1,), jnp.float32),
    }
    return params, ref


def reference_forward(x, p):
    """Pure-JAX reference using the same bf16-weight / f32-accumulate recipe.
    (Parity with a true f32 torch Discriminator is ~1e-3 level due to bf16.)"""
    xb = x.astype(jnp.bfloat16)
    w1 = p["w1"].astype(jnp.bfloat16)
    w2 = p["w2"].astype(jnp.bfloat16)
    w3 = p["w3"].astype(jnp.bfloat16).astype(jnp.float32)
    h1 = jnp.dot(xb, w1.T, preferred_element_type=jnp.float32) + p["b1"]
    h1 = _leaky_relu(h1).astype(jnp.bfloat16)
    h2 = jnp.dot(h1, w2.T, preferred_element_type=jnp.float32) + p["b2"]
    h2 = _leaky_relu(h2)
    return jnp.dot(h2, w3.T) + p["b3"]                # (B, 1)


if __name__ == "__main__":
    key = jax.random.PRNGKey(0)
    kx, kp = jax.random.split(key)

    in_dim = 32
    batch = 8
    x = jax.random.normal(kx, (batch, in_dim), dtype=jnp.float32)
    params, ref_params = init_params(kp, in_dim)

    out = jax.block_until_ready(discriminator_forward(x, params))
    ref = reference_forward(x, ref_params)
    assert out.shape == (batch, 1), out.shape
    assert jnp.allclose(out, ref, atol=2e-3, rtol=2e-3), (
        f"max abs err {jnp.max(jnp.abs(out - ref))}")

    # Multi-tile grid + ragged batch (exercises padding, weight residency and
    # the automatic tile_b choice: B=300 -> tile_b=128, 3 grid steps).
    x2 = jax.random.normal(jax.random.PRNGKey(1), (300, in_dim), jnp.float32)
    out2 = jax.block_until_ready(discriminator_forward(x2, params))
    ref2 = reference_forward(x2, ref_params)
    assert out2.shape == (300, 1), out2.shape
    assert jnp.allclose(out2, ref2, atol=2e-3, rtol=2e-3), (
        f"max abs err {jnp.max(jnp.abs(out2 - ref2))}")

    print("KERNEL_OK")
</pallas_src>

<mosaic_0001>
module attributes {stable_mosaic.version = 11 : i64} {
  func.func @discriminator_kernel(%arg0: i32, %arg1: memref<128x32xf32, #tpu.memory_space<vmem>>, %arg2: memref<128x32xbf16, #tpu.memory_space<vmem>>, %arg3: memref<128x1xf32, #tpu.memory_space<vmem>>, %arg4: memref<128x128xbf16, #tpu.memory_space<vmem>>, %arg5: memref<128x1xf32, #tpu.memory_space<vmem>>, %arg6: memref<128x1xbf16, #tpu.memory_space<vmem>>, %arg7: memref<1xf32, #tpu.memory_space<smem>>, %arg8: memref<1x128xf32, #tpu.memory_space<vmem>>) attributes {dimension_semantics = [#tpu.dimension_semantics<parallel>], iteration_bounds = array<i64: 1>, scalar_prefetch = 0 : i64, scratch_operands = 0 : i64, tpu.core_type = #tpu.core_type<tc>, window_params = [{transform_indices = @transform_0, window_bounds = array<i64: 128, 32>}, {pipeline_mode = #tpu.pipeline_mode<synchronous>, transform_indices = @transform_1, window_bounds = array<i64: 128, 32>}, {pipeline_mode = #tpu.pipeline_mode<synchronous>, transform_indices = @transform_2, window_bounds = array<i64: 128, 1>}, {pipeline_mode = #tpu.pipeline_mode<synchronous>, transform_indices = @transform_3, window_bounds = array<i64: 128, 128>}, {pipeline_mode = #tpu.pipeline_mode<synchronous>, transform_indices = @transform_4, window_bounds = array<i64: 128, 1>}, {pipeline_mode = #tpu.pipeline_mode<synchronous>, transform_indices = @transform_5, window_bounds = array<i64: 128, 1>}, {transform_indices = @transform_6, window_bounds = array<i64: 1>}, {transform_indices = @transform_7, window_bounds = array<i64: 1, 128>}]} {
    %c0 = arith.constant 0 : index
    %c0_0 = arith.constant 0 : index
    %0 = vector.load %arg1[%c0, %c0_0] : memref<128x32xf32, #tpu.memory_space<vmem>>, vector<128x32xf32>
    %1 = arith.truncf %0 : vector<128x32xf32> to vector<128x32xbf16>
    %c0_1 = arith.constant 0 : index
    %c0_2 = arith.constant 0 : index
    %2 = vector.load %arg2[%c0_1, %c0_2] : memref<128x32xbf16, #tpu.memory_space<vmem>>, vector<128x32xbf16>
    %cst = arith.constant dense<0.000000e+00> : vector<128x128xf32>
    %3 = tpu.matmul %2, %1, %cst {dimension_numbers = #tpu.dot_dimension_numbers<[1], [1], [0], [0], [0, 0, 1, 0], [], []>} : vector<128x32xbf16>, vector<128x32xbf16>, vector<128x128xf32> -> vector<128x128xf32>
    %c0_3 = arith.constant 0 : index
    %c0_4 = arith.constant 0 : index
    %4 = vector.load %arg3[%c0_3, %c0_4] : memref<128x1xf32, #tpu.memory_space<vmem>>, vector<128x1xf32>
    %5 = vector.broadcast %4 : vector<128x1xf32> to vector<128x128xf32>
    %6 = arith.addf %3, %5 : vector<128x128xf32>
    %cst_5 = arith.constant 0.00999999977 : f32
    %7 = vector.broadcast %cst_5 : f32 to vector<128x128xf32>
    %8 = arith.mulf %7, %6 : vector<128x128xf32>
    %9 = arith.maximumf %6, %8 : vector<128x128xf32>
    %c0_6 = arith.constant 0 : index
    %c0_7 = arith.constant 0 : index
    %10 = vector.load %arg4[%c0_6, %c0_7] : memref<128x128xbf16, #tpu.memory_space<vmem>>, vector<128x128xbf16>
    %11 = arith.truncf %9 : vector<128x128xf32> to vector<128x128xbf16>
    %cst_8 = arith.constant dense<0.000000e+00> : vector<128x128xf32>
    %12 = tpu.matmul %10, %11, %cst_8 {dimension_numbers = #tpu.dot_dimension_numbers<[1], [0], [0], [1], [0, 0, 1, 1], [], []>} : vector<128x128xbf16>, vector<128x128xbf16>, vector<128x128xf32> -> vector<128x128xf32>
    %c0_9 = arith.constant 0 : index
    %c0_10 = arith.constant 0 : index
    %13 = vector.load %arg5[%c0_9, %c0_10] : memref<128x1xf32, #tpu.memory_space<vmem>>, vector<128x1xf32>
    %14 = vector.broadcast %13 : vector<128x1xf32> to vector<128x128xf32>
    %15 = arith.addf %12, %14 : vector<128x128xf32>
    %cst_11 = arith.constant 0.00999999977 : f32
    %16 = vector.broadcast %cst_11 : f32 to vector<128x128xf32>
    %17 = arith.mulf %16, %15 : vector<128x128xf32>
    %18 = arith.maximumf %15, %17 : vector<128x128xf32>
    %c0_12 = arith.constant 0 : index
    %c0_13 = arith.constant 0 : index
    %19 = vector.load %arg6[%c0_12, %c0_13] : memref<128x1xbf16, #tpu.memory_space<vmem>>, vector<128x1xbf16>
    %20 = arith.extf %19 : vector<128x1xbf16> to vector<128x1xf32>
    %21 = vector.broadcast %20 : vector<128x1xf32> to vector<128x128xf32>
    %22 = arith.mulf %18, %21 : vector<128x128xf32>
    %cst_14 = arith.constant dense<0.000000e+00> : vector<128xf32>
    %23 = vector.multi_reduction <add>, %22, %cst_14 [0] : vector<128x128xf32> to vector<128xf32>
    %24 = vector.shape_cast %23 : vector<128xf32> to vector<1x128xf32>
    %c0_15 = arith.constant 0 : index
    %25 = memref.load %arg7[%c0_15] : memref<1xf32, #tpu.memory_space<smem>>
    %26 = vector.broadcast %25 : f32 to vector<1x128xf32>
    %27 = arith.addf %24, %26 : vector<1x128xf32>
    %c0_16 = arith.constant 0 : index
    %c0_17 = arith.constant 0 : index
    %28 = vector.load %arg8[%c0_16, %c0_17] : memref<1x128xf32, #tpu.memory_space<vmem>>, vector<1x128xf32>
    tpu.vector_store %arg8[%c0_16, %c0_17], %27 {strides = array<i32>} : memref<1x128xf32, #tpu.memory_space<vmem>>, vector<1x128xf32>,
    return
  }
  func.func @transform_0(%arg0: i32) -> (i32, i32) {
    %c0_i32 = arith.constant 0 : i32
    %c0_i32_0 = arith.constant 0 : i32
    return %arg0, %c0_i32 : i32, i32
  }
  func.func @transform_1(%arg0: i32) -> (i32, i32) {
    %c0_i32 = arith.constant 0 : i32
    %c0_i32_0 = arith.constant 0 : i32
    %c0_i32_1 = arith.constant 0 : i32
    return %c0_i32, %c0_i32_0 : i32, i32
  }
  func.func @transform_2(%arg0: i32) -> (i32, i32) {
    %c0_i32 = arith.constant 0 : i32
    %c0_i32_0 = arith.constant 0 : i32
    %c0_i32_1 = arith.constant 0 : i32
    return %c0_i32, %c0_i32_0 : i32, i32
  }
  func.func @transform_3(%arg0: i32) -> (i32, i32) {
    %c0_i32 = arith.constant 0 : i32
    %c0_i32_0 = arith.constant 0 : i32
    %c0_i32_1 = arith.constant 0 : i32
    return %c0_i32, %c0_i32_0 : i32, i32
  }
  func.func @transform_4(%arg0: i32) -> (i32, i32) {
    %c0_i32 = arith.constant 0 : i32
    %c0_i32_0 = arith.constant 0 : i32
    %c0_i32_1 = arith.constant 0 : i32
    return %c0_i32, %c0_i32_0 : i32, i32
  }
  func.func @transform_5(%arg0: i32) -> (i32, i32) {
    %c0_i32 = arith.constant 0 : i32
    %c0_i32_0 = arith.constant 0 : i32
    %c0_i32_1 = arith.constant 0 : i32
    return %c0_i32, %c0_i32_0 : i32, i32
  }
  func.func @transform_6(%arg0: i32) -> i32 {
    %c0_i32 = arith.constant 0 : i32
    %c0_i32_0 = arith.constant 0 : i32
    return %c0_i32 : i32
  }
  func.func @transform_7(%arg0: i32) -> (i32, i32) {
    %c0_i32 = arith.constant 0 : i32
    %c0_i32_0 = arith.constant 0 : i32
    return %c0_i32, %arg0 : i32, i32
  }
}

</mosaic_0001>

<bundles_post_ra>
// kernel: tpu_custom_call.1
= control target key start
LH: loop header
LB: loop body
LE: loop exit
PB: predicated region body
PF: predicated region fallthrough
CT: control target
= control target key end

     0   :  { %vm204_vm0 = vcmask 261120   ;;  %s1268_s0 = inlined_call_operand.vmem [shape: f32[128,32], index: 0, kind: input, shape index: {}]   ;;  %s1269_s1 = inlined_call_operand.vmem [shape: bf16[128,32], index: 1, kind: input, shape index: {}]   ;;  %s1270_s2 = inlined_call_operand.vmem [shape: f32[128,1], index: 2, kind: input, shape index: {}]   ;;  %s1271_s3 = inlined_call_operand.vmem [shape: bf16[128,128], index: 3, kind: input, shape index: {}]   ;;  %s1272_s4 = inlined_call_operand.vmem [shape: f32[128,1], index: 4, kind: input, shape index: {}]   ;;  %s1273_s5 = inlined_call_operand.vmem [shape: bf16[128,1], index: 5, kind: input, shape index: {}]   ;;  %s1274_s6 = inlined_call_operand.<no memory space> [shape: f32[1], index: 6, kind: input, shape index: {}]   ;;  %s1275_s7 = inlined_call_operand.hbm [shape: f32[1,128], index: 7, kind: output, shape index: {}]  }
   0x1   :  { %v42_v0 = vld [vmem:[%s1268_s0 + $0x70] sm:$0xff]  ;;  %v43_v1 = vld [vmem:[%s1268_s0 + $0x78] sm:$0xff]  ;;  %v40_v3 = vld [vmem:[%s1268_s0 + $0x60] sm:$0xff] }
   0x2   :  { %v51_v2 = vpack.c.bf16 %v43_v1, %v42_v0  ;;  %v41_v4 = vld [vmem:[%s1268_s0 + $0x68] sm:$0xff] }
   0x4   :  { %v251_v5 = vsel %vm204_vm0, %v51_v2, 0 }
   0x5   :  { %13 = vsyncpa [#allocation4], 0  ;;  %879 = vmatpush.bf16.xpose.msra.mxu2 %v251_v5  ;;  %253 = vmatpush.bf16.xpose.msra.mxu0 %v251_v5  ;;  %v82_v6 = vld [vmem:[%s1270_s2 + $0x70] sm:$0xff]  ;;  %v50_v7 = vpack.c.bf16 %v41_v4, %v40_v3  ;;  %v966_v8 = vmov 0   ;;  %v39_v11 = vld [vmem:[%s1268_s0 + $0x58] sm:$0xff]  ;;  %s967_s21 = smov [#allocation3]  }
   0x6   :  { %897 = vset.pattern.permute.xlu0 %v966_v8  ;;  %898 = vset.pattern.permute.xlu1 %v966_v8  ;;  %v38_v10 = vld [vmem:[%s1268_s0 + $0x50] sm:$0xff]  ;;  %v83_v12 = vld [vmem:[%s1270_s2 + $0x78] sm:$0xff]  ;;  %v80_v13 = vld [vmem:[%s1270_s2 + $0x60] sm:$0xff]  ;;  %s741_s22 = sshll.u32 %s967_s21, 4  ;;  %s743_s25 = sshll.u32 %s1275_s7, 4  ;;  %s742_s22 = int_to_ptr.vmem [resolvable:$true] %s741_s22  ;;  %s744_s25 = int_to_ptr.hbm [resolvable:$true] %s743_s25 }
   0x7   :  { %156 = vperm.xlu0 %897, %v82_v6   ;;  %899 = vset.pattern.permute.xlu2 %v966_v8  ;;  %v248_v9 = vsel %vm204_vm0, %v50_v7, 0  ;;  %v49_v14 = vpack.c.bf16 %v39_v11, %v38_v10  ;;  %v36_v16 = vld [vmem:[%s1268_s0 + $0x40] sm:$0xff]  ;;  %v37_v17 = vld [vmem:[%s1268_s0 + $0x48] sm:$0xff]  ;;  %v34_v22 = vld [vmem:[%s1268_s0 + $0x30] sm:$0xff] }
   0x8   :  { %146 = vperm.xlu1 %898, %v80_v13   ;;  %v76_v18 = vld [vmem:[%s1270_s2 + $0x40] sm:$0xff]  ;;  %v81_v19 = vld [vmem:[%s1270_s2 + $0x68] sm:$0xff]  ;;  %v48_v20 = vpack.c.bf16 %v37_v17, %v36_v16  ;;  %v35_v23 = vld [vmem:[%s1268_s0 + $0x38] sm:$0xff] }
   0x9   :  { %v245_v15 = vsel %vm204_vm0, %v49_v14, 0  ;;  %v75_v24 = vld [vmem:[%s1270_s2 + $0x38] sm:$0xff]  ;;  %v47_v25 = vpack.c.bf16 %v35_v23, %v34_v22  ;;  %v32_v27 = vld [vmem:[%s1268_s0 + $0x20] sm:$0xff]  ;;  %v33_v28 = vld [vmem:[%s1268_s0 + $0x28] sm:$0xff] }
   0xa   :  { %v242_v21 = vsel %vm204_vm0, %v48_v20, 0  ;;  %v77_v29 = vld [vmem:[%s1270_s2 + $0x48] sm:$0xff]  ;;  %v70_v30 = vld [vmem:[%s1270_s2 + $0x10] sm:$0xff]  ;;  %v46_v32 = vpack.c.bf16 %v33_v28, %v32_v27  ;;  %v31_v35 = vld [vmem:[%s1268_s0 + $0x18] sm:$0xff] }
   0xb   :  { %v239_v26 = vsel %vm204_vm0, %v47_v25, 0  ;;  %v78_v31 = vld [vmem:[%s1270_s2 + $0x50] sm:$0xff]  ;;  %v72_v36 = vld [vmem:[%s1270_s2 + $0x20] sm:$0xff]  ;;  %v69_v37 = vld [vmem:[%s1270_s2 + $0x8] sm:$0xff] }
   0xc   :  { %136 = vperm.xlu2 %899, %v78_v31   ;;  %v236_v33 = vsel %vm204_vm0, %v46_v32, 0  ;;  %v30_v34 = vld [vmem:[%s1268_s0 + $0x10] sm:$0xff]  ;;  %v28_v40 = vld [vmem:[%s1268_s0] sm:$0xff]  ;;  %v29_v41 = vld [vmem:[%s1268_s0 + $0x8] sm:$0xff] }
   0xd   :  { %880 = vmatpush.bf16.xpose.msra.mxu2 %v248_v9  ;;  %254 = vmatpush.bf16.xpose.msra.mxu0 %v248_v9  ;;  %v45_v38 = vpack.c.bf16 %v31_v35, %v30_v34  ;;  %v71_v42 = vld [vmem:[%s1270_s2 + $0x18] sm:$0xff]  ;;  %v360_v44 = vld [vmem:[%s1272_s4 + $0x10] sm:$0xff]  ;;  %v44_v45 = vpack.c.bf16 %v29_v41, %v28_v40  ;;  %v358_v47 = vld [vmem:[%s1272_s4] sm:$0xff] }
   0xe   :  { %v79_v43 = vld [vmem:[%s1270_s2 + $0x58] sm:$0xff]  ;;  %v74_v48 = vld [vmem:[%s1270_s2 + $0x30] sm:$0xff]  ;;  %v363_v49 = vld [vmem:[%s1272_s4 + $0x28] sm:$0xff] }
   0xf   :  { %161 = vperm.xlu0 %897, %v83_v12   ;;  %v233_v39 = vsel %vm204_vm0, %v45_v38, 0  ;;  %v230_v46 = vsel %vm204_vm0, %v44_v45, 0  ;;  %v827_v50 = vld [vmem:[%s1269_s1 + $0x18] sm:$0xff]  ;;  %v824_v51 = vld [vmem:[%s1269_s1] sm:$0xff]  ;;  %v73_v53 = vld [vmem:[%s1270_s2 + $0x28] sm:$0xff] }
  0x10   :  { %151 = vperm.xlu1 %898, %v81_v19   ;;  %v361_v52 = vld [vmem:[%s1272_s4 + $0x18] sm:$0xff]  ;;  %v366_v54 = vld [vmem:[%s1272_s4 + $0x40] sm:$0xff]  ;;  %v364_v55 = vld [vmem:[%s1272_s4 + $0x30] sm:$0xff] }
  0x11   :  { %v68_v56 = vld [vmem:[%s1270_s2] sm:$0xff]  ;;  %v369_v57 = vld [vmem:[%s1272_s4 + $0x58] sm:$0xff]  ;;  %v825_v59 = vld [vmem:[%s1269_s1 + $0x8] sm:$0xff] }
  0x12   :  { %v828_v58 = vld [vmem:[%s1269_s1 + $0x20] sm:$0xff]  ;;  %v367_v60 = vld [vmem:[%s1272_s4 + $0x48] sm:$0xff]  ;;  %v372_v61 = vld [vmem:[%s1272_s4 + $0x70] sm:$0xff] }
  0x13   :  { %v359_v62 = vld [vmem:[%s1272_s4 + $0x8] sm:$0xff]  ;;  %v370_v2 = vld [vmem:[%s1272_s4 + $0x60] sm:$0xff]  ;;  %v826_v6 = vld [vmem:[%s1269_s1 + $0x10] sm:$0xff] }
  0x14   :  { %141 = vperm.xlu2 %899, %v79_v43   ;;  %v872_v63 = vld [vmem:[%s1273_s5 + $0x8] sm:$0xff]   ;;  %v362_v4 = vld [vmem:[%s1272_s4 + $0x20] sm:$0xff]  ;;  %v373_v7 = vld [vmem:[%s1272_s4 + $0x78] sm:$0xff] }
  0x15   :  { %881 = vmatpush.bf16.xpose.msra.mxu2 %v245_v15  ;;  %255 = vmatpush.bf16.xpose.msra.mxu0 %v245_v15  ;;  %v846_v0 = vunpack.c.l.bf16 %v872_v63  ;;  %v847_v1 = vunpack.c.h.bf16 %v872_v63  ;;  %v829_v5 = vld [vmem:[%s1269_s1 + $0x28] sm:$0xff]  ;;  %v875_v8 = vld [vmem:[%s1273_s5 + $0x20] sm:$0xff]   ;;  %v365_v9 = vld [vmem:[%s1272_s4 + $0x38] sm:$0xff] }
  0x16   :  { %v858_v10 = vunpack.c.l.bf16 %v875_v8  ;;  %v859_v11 = vunpack.c.h.bf16 %v875_v8  ;;  %v873_v12 = vld [vmem:[%s1273_s5 + $0x10] sm:$0xff]   ;;  %v878_v15 = vld [vmem:[%s1273_s5 + $0x38] sm:$0xff]   ;;  %v371_v27 = vld [vmem:[%s1272_s4 + $0x68] sm:$0xff] }
  0x17   :  { %126 = vperm.xlu0 %897, %v76_v18   ;;  %v905_v3 = vpack.i.bf16 %v847_v1, %v846_v0  ;;  %v850_v13 = vunpack.c.l.bf16 %v873_v12  ;;  %v851_v14 = vunpack.c.h.bf16 %v873_v12  ;;  %v870_v17 = vunpack.c.l.bf16 %v878_v15  ;;  %v368_v20 = vld [vmem:[%s1272_s4 + $0x50] sm:$0xff]  ;;  %v841_v28 = vld [vmem:[%s1273_s5] sm:$0xff]   ;;  %v874_v32 = vld [vmem:[%s1273_s5 + $0x18] sm:$0xff]  }
  0x18   :  { %131 = vperm.xlu1 %898, %v77_v29   ;;  %v920_v16 = vpack.i.bf16 %v859_v11, %v858_v10  ;;  %v871_v18 = vunpack.c.h.bf16 %v878_v15  ;;  %v830_v25 = vld [vmem:[%s1269_s1 + $0x30] sm:$0xff]  ;;  %v842_v29 = vunpack.c.l.bf16 %v841_v28  ;;  %v855_v34 = vunpack.c.h.bf16 %v874_v32  ;;  %v831_v35 = vld [vmem:[%s1269_s1 + $0x38] sm:$0xff] }
  0x19   :  { %v910_v19 = vpack.i.bf16 %v851_v14, %v850_v13 }
  0x1a   :  { %v935_v22 = vpack.i.bf16 %v871_v18, %v870_v17 }
  0x1c   :  { %116 = vperm.xlu2 %899, %v74_v48  }
  0x1d   :  { %882 = vmatpush.bf16.xpose.msra.mxu2 %v242_v21  ;;  %256 = vmatpush.bf16.xpose.msra.mxu0 %v242_v21  ;;  %v876_v21 = vld [vmem:[%s1273_s5 + $0x28] sm:$0xff]  }
  0x1e   :  { %v862_v23 = vunpack.c.l.bf16 %v876_v21 }
  0x1f   :  { %121 = vperm.xlu0 %897, %v75_v24   ;;  %v863_v24 = vunpack.c.h.bf16 %v876_v21 }
  0x20   :  { %106 = vperm.xlu1 %898, %v72_v36  }
  0x24   :  { %111 = vperm.xlu2 %899, %v73_v53  }
  0x25   :  { %883 = vmatpush.bf16.xpose.msra.mxu2 %v239_v26  ;;  %257 = vmatpush.bf16.xpose.msra.mxu0 %v239_v26  ;;  %v925_v26 = vpack.i.bf16 %v863_v24, %v862_v23 }
  0x27   :  { %96 = vperm.xlu0 %897, %v70_v30   ;;  %v843_v30 = vunpack.c.h.bf16 %v841_v28 }
  0x28   :  { %101 = vperm.xlu1 %898, %v71_v42  }
  0x29   :  { %v900_v31 = vpack.i.bf16 %v843_v30, %v842_v29 }
  0x2c   :  { %86 = vperm.xlu2 %899, %v68_v56  }
  0x2d   :  { %884 = vmatpush.bf16.xpose.msra.mxu2 %v236_v33  ;;  %258 = vmatpush.bf16.xpose.msra.mxu0 %v236_v33  ;;  %v854_v33 = vunpack.c.l.bf16 %v874_v32 }
  0x2f   :  { %91 = vperm.xlu0 %897, %v69_v37   ;;  %v915_v36 = vpack.i.bf16 %v855_v34, %v854_v33  ;;  %v877_v37 = vld [vmem:[%s1273_s5 + $0x30] sm:$0xff]  }
  0x30   :  { %376 = vperm.xlu1 %898, %v358_v47   ;;  %v866_v38 = vunpack.c.l.bf16 %v877_v37 }
  0x34   :  { %381 = vperm.xlu2 %899, %v359_v62  }
  0x35   :  { %885 = vmatpush.bf16.xpose.msra.mxu2 %v233_v39  ;;  %259 = vmatpush.bf16.xpose.msra.mxu0 %v233_v39  ;;  %v867_v39 = vunpack.c.h.bf16 %v877_v37 }
  0x37   :  { %386 = vperm.xlu0 %897, %v360_v44   ;;  %v930_v40 = vpack.i.bf16 %v867_v39, %v866_v38 }
  0x38   :  { %391 = vperm.xlu1 %898, %v361_v52  }
  0x3c   :  { %396 = vperm.xlu2 %899, %v362_v4  }
  0x3d   :  { %886 = vmatpush.bf16.xpose.msra.mxu2 %v230_v46  ;;  %260 = vmatpush.bf16.xpose.msra.mxu0 %v230_v46 }
  0x3f   :  { %401 = vperm.xlu0 %897, %v363_v49  }
  0x40   :  { %406 = vperm.xlu1 %898, %v364_v55  }
  0x44   :  { %787 = vmatmul.msk.bf16.vlgmr.msra.gmra.mxu2 %vm204_vm0, %v827_v50  ;;  %784 = vmatmul.msk.bf16.vlgmr.msra.gmra.mxu0 %vm204_vm0, %v824_v51 }
  0x45   :  { %411 = vperm.xlu2 %899, %v365_v9  }
  0x47   :  { %416 = vperm.xlu0 %897, %v366_v54  }
  0x48   :  { %421 = vperm.xlu1 %898, %v367_v60  }
  0x4d   :  { %426 = vperm.xlu2 %899, %v368_v20  }
  0x4f   :  { %431 = vperm.xlu0 %897, %v369_v57  }
  0x50   :  { %436 = vperm.xlu1 %898, %v370_v2  }
  0x54   :  { %788 = vmatmul.msk.bf16.gmra.mxu2 %vm204_vm0, %v828_v58  ;;  %785 = vmatmul.msk.bf16.gmra.mxu0 %vm204_vm0, %v825_v59 }
  0x55   :  { %441 = vperm.xlu2 %899, %v371_v27  }
  0x57   :  { %446 = vperm.xlu0 %897, %v372_v61  }
  0x58   :  { %451 = vperm.xlu1 %898, %v373_v7  }
  0x5d   :  { %901 = vperm.xlu2 %899, %v900_v31  }
  0x5f   :  { %906 = vperm.xlu0 %897, %v905_v3  }
  0x60   :  { %911 = vperm.xlu1 %898, %v910_v19  }
  0x64   :  { %789 = vmatmul.msk.bf16.gmra.mxu2 %vm204_vm0, %v829_v5  ;;  %786 = vmatmul.msk.bf16.gmra.mxu0 %vm204_vm0, %v826_v6 }
  0x65   :  { %916 = vperm.xlu2 %899, %v915_v36  }
  0x66   :  { %v137_v42 = vpop.permute.xlu2 %136 }
  0x67   :  { %921 = vperm.xlu0 %897, %v920_v16  }
  0x68   :  { %926 = vperm.xlu1 %898, %v925_v26  }
  0x6d   :  { %931 = vperm.xlu2 %899, %v930_v40  }
  0x6e   :  { %v142_v44 = vpop.permute.xlu2 %141 }
  0x6f   :  { %936 = vperm.xlu0 %897, %v935_v22  }
  0x74   :  { %790 = vmatmul.msk.bf16.gmra.mxu2 %vm204_vm0, %v830_v25 }
  0x76   :  { %v117_v47 = vpop.permute.xlu2 %116 }
  0x79   :  { %v157_v41 = vpop.permute.xlu0 %156 }
  0x7a   :  { %v147_v0 = vpop.permute.xlu1 %146 }
  0x7e   :  { %v112_v30 = vpop.permute.xlu2 %111 }
  0x81   :  { %v162_v43 = vpop.permute.xlu0 %161 }
  0x82   :  { %v152_v3 = vpop.permute.xlu1 %151 }
  0x84   :  { %791 = vmatmul.msk.bf16.gmra.mxu2 %vm204_vm0, %v831_v35 }
  0x89   :  { %v127_v45 = vpop.permute.xlu0 %126 }
  0x8a   :  { %v132_v7 = vpop.permute.xlu1 %131 }
  0x91   :  { %v122_v49 = vpop.permute.xlu0 %121 }
  0x92   :  { %v107_v25 = vpop.permute.xlu1 %106 }
  0x99   :  { %v97_v29 = vpop.permute.xlu0 %96 }
  0xc1   :  { %v262_v60 = vpop.f32.mrf.mxu0 }
  0xc7   :  { %v277_v46 = vpop.f32.mrf.mxu2 }
  0xc8   :  { %v278_v48 = vadd.f32 %v277_v46, %v117_v47 }
  0xc9   :  { %v264_v62 = vpop.f32.mrf.mxu0 }
  0xca   :  { %v308_v51 = vmul.f32 0.01, %v278_v48 }
  0xcc   :  { %v324_v54 = vmax.f32 %v278_v48, %v308_v51  ;;  %v92_v48 = vpop.permute.xlu0 %91 }
  0xcd   :  { %v265_v51 = vadd.f32 %v264_v62, %v92_v48  ;;  %v832_v62 = vld [vmem:[%s1271_s3] sm:$0xff] }
  0xcf   :  { %v279_v50 = vpop.f32.mrf.mxu2 }
  0xd0   :  { %v280_v52 = vadd.f32 %v279_v50, %v122_v49  ;;  %v87_v49 = vpop.permute.xlu2 %86 }
  0xd1   :  { %v267_v1 = vpop.f32.mrf.mxu0  ;;  %v263_v50 = vadd.f32 %v262_v60, %v87_v49 }
  0xd2   :  { %v309_v53 = vmul.f32 0.01, %v280_v52 }
  0xd4   :  { %v325_v55 = vmax.f32 %v280_v52, %v309_v53 }
  0xd6   :  { %v1216_v56 = vpack.c.bf16 %v325_v55, %v324_v54 }
  0xd7   :  { %v282_v57 = vpop.f32.mrf.mxu2 }
  0xd8   :  { %v283_v26 = vadd.f32 %v282_v57, %v127_v45  ;;  %v302_v57 = vmul.f32 0.01, %v263_v50 }
  0xd9   :  { %v269_v4 = vpop.f32.mrf.mxu0 }
  0xda   :  { %v310_v35 = vmul.f32 0.01, %v283_v26 }
  0xdf   :  { %v284_v58 = vpop.f32.mrf.mxu2 }
  0xe0   :  { %v285_v21 = vadd.f32 %v284_v58, %v132_v7  ;;  %v303_v58 = vmul.f32 0.01, %v265_v51  ;;  %v835_v7 = vld [vmem:[%s1271_s3 + $0x18] sm:$0xff] }
  0xe1   :  { %v272_v13 = vpop.f32.mrf.mxu0 }
  0xe2   :  { %v311_v31 = vmul.f32 0.01, %v285_v21  ;;  %v273_v38 = vadd.f32 %v272_v13, %v107_v25  ;;  %v387_v13 = vpop.permute.xlu0 %386 }
  0xe4   :  { %v327_v37 = vmax.f32 %v285_v21, %v311_v31  ;;  %v306_v45 = vmul.f32 0.01, %v273_v38 }
  0xe6   :  { %v322_v54 = vmax.f32 %v273_v38, %v306_v45 }
  0xe7   :  { %v287_v59 = vpop.f32.mrf.mxu2 }
  0xe8   :  { %v288_v17 = vadd.f32 %v287_v59, %v137_v42  ;;  %v102_v42 = vpop.permute.xlu1 %101 }
  0xe9   :  { %v274_v34 = vpop.f32.mrf.mxu0 }
  0xea   :  { %v312_v27 = vmul.f32 0.01, %v288_v17  ;;  %v275_v39 = vadd.f32 %v274_v34, %v112_v30 }
  0xec   :  { %v328_v36 = vmax.f32 %v288_v17, %v312_v27  ;;  %v307_v46 = vmul.f32 0.01, %v275_v39  ;;  %v402_v17 = vpop.permute.xlu0 %401 }
  0xee   :  { %v323_v55 = vmax.f32 %v275_v39, %v307_v46 }
  0xef   :  { %v289_v61 = vpop.f32.mrf.mxu2 }
  0xf0   :  { %v290_v14 = vadd.f32 %v289_v61, %v142_v44  ;;  %v270_v44 = vadd.f32 %v269_v4, %v102_v42  ;;  %v838_v4 = vld [vmem:[%s1271_s3 + $0x30] sm:$0xff] }
  0xf2   :  { %v313_v22 = vmul.f32 0.01, %v290_v14  ;;  %v305_v53 = vmul.f32 0.01, %v270_v44 }
  0xf4   :  { %v329_v32 = vmax.f32 %v290_v14, %v313_v22  ;;  %v321_v61 = vmax.f32 %v270_v44, %v305_v53  ;;  %v417_v22 = vpop.permute.xlu0 %416 }
  0xf6   :  { %v355_v40 = vpack.c.bf16 %v329_v32, %v328_v36 }
  0xf7   :  { %v292_v63 = vpop.f32.mrf.mxu2 }
  0xf8   :  { %v293_v10 = vadd.f32 %v292_v63, %v147_v0  ;;  %v352_v63 = vpack.c.bf16 %v323_v55, %v322_v54  ;;  %v318_v0 = vmax.f32 %v263_v50, %v302_v57 }
  0xfa   :  { %v314_v18 = vmul.f32 0.01, %v293_v10 }
  0xfc   :  { %v330_v28 = vmax.f32 %v293_v10, %v314_v18  ;;  %v377_v10 = vpop.permute.xlu1 %376  ;;  %v432_v27 = vpop.permute.xlu0 %431 }
  0xff   :  { %v294_v2 = vpop.f32.mrf.mxu2 }
 0x100   :  { %v295_v8 = vadd.f32 %v294_v2, %v152_v3  ;;  %v833_v3 = vld [vmem:[%s1271_s3 + $0x8] sm:$0xff] }
 0x102   :  { %v315_v15 = vmul.f32 0.01, %v295_v8 }
 0x104   :  { %v331_v23 = vmax.f32 %v295_v8, %v315_v15  ;;  %v836_v8 = vld [vmem:[%s1271_s3 + $0x20] sm:$0xff]  ;;  %v392_v14 = vpop.permute.xlu1 %391  ;;  %v1252_v34 = vpop.permute.xlu0 %446 }
 0x106   :  { %v356_v33 = vpack.c.bf16 %v331_v23, %v330_v28 }
 0x107   :  { %v297_v5 = vpop.f32.mrf.mxu2 }
 0x108   :  { %v298_v6 = vadd.f32 %v297_v5, %v157_v41  ;;  %v326_v41 = vmax.f32 %v283_v26, %v310_v35  ;;  %v834_v5 = vld [vmem:[%s1271_s3 + $0x10] sm:$0xff] }
 0x10a   :  { %v316_v11 = vmul.f32 0.01, %v298_v6  ;;  %v354_v47 = vpack.c.bf16 %v327_v37, %v326_v41 }
 0x10c   :  { %v332_v19 = vmax.f32 %v298_v6, %v316_v11  ;;  %v839_v6 = vld [vmem:[%s1271_s3 + $0x38] sm:$0xff]  ;;  %v382_v11 = vpop.permute.xlu2 %381  ;;  %v407_v18 = vpop.permute.xlu1 %406 }
 0x10d   :  { %v907_v54 = vpop.permute.xlu0 %906 }
 0x10f   :  { %v299_v9 = vpop.f32.mrf.mxu2 }
 0x110   :  { %v300_v12 = vadd.f32 %v299_v9, %v162_v43  ;;  %v268_v43 = vadd.f32 %v267_v1, %v97_v29  ;;  %v319_v1 = vmax.f32 %v265_v51, %v303_v58  ;;  %v908_v58 = vunpack.i.l.bf16 %v907_v54 }
 0x112   :  { %v317_v16 = vmul.f32 0.01, %v300_v12  ;;  %v304_v52 = vmul.f32 0.01, %v268_v43  ;;  %v350_v60 = vpack.c.bf16 %v319_v1, %v318_v0  ;;  %v909_v1 = vunpack.i.h.bf16 %v907_v54 }
 0x114   :  { %v333_v20 = vmax.f32 %v300_v12, %v317_v16  ;;  %v320_v59 = vmax.f32 %v268_v43, %v304_v52  ;;  %v397_v16 = vpop.permute.xlu2 %396 }
 0x116   :  { %v357_v24 = vpack.c.bf16 %v333_v20, %v332_v19  ;;  %v351_v2 = vpack.c.bf16 %v321_v61, %v320_v59 }
 0x118   :  { %502 = vmatpush.bf16.msra.mxu1 %v357_v24  ;;  %887 = vmatpush.bf16.msra.mxu3 %v357_v24  ;;  %v1244_v24 = vpop.permute.xlu1 %421 }
 0x11c   :  { %503 = vmatpush.bf16.msra.mxu1 %v356_v33  ;;  %888 = vmatpush.bf16.msra.mxu3 %v356_v33  ;;  %v412_v21 = vpop.permute.xlu2 %411 }
 0x120   :  { %504 = vmatpush.bf16.msra.mxu1 %v355_v40  ;;  %889 = vmatpush.bf16.msra.mxu3 %v355_v40  ;;  %v1246_v29 = vpop.permute.xlu1 %436 }
 0x124   :  { %505 = vmatpush.bf16.msra.mxu1 %v354_v47  ;;  %890 = vmatpush.bf16.msra.mxu3 %v354_v47  ;;  %v427_v26 = vpop.permute.xlu2 %426 }
 0x128   :  { %506 = vmatpush.bf16.msra.mxu1 %v1216_v56  ;;  %891 = vmatpush.bf16.msra.mxu3 %v1216_v56  ;;  %v837_v56 = vld [vmem:[%s1271_s3 + $0x28] sm:$0xff]  ;;  %v1254_v38 = vpop.permute.xlu1 %451 }
 0x12c   :  { %507 = vmatpush.bf16.msra.mxu1 %v352_v63  ;;  %892 = vmatpush.bf16.msra.mxu3 %v352_v63  ;;  %v1250_v31 = vpop.permute.xlu2 %441 }
 0x130   :  { %508 = vmatpush.bf16.msra.mxu1 %v351_v2  ;;  %893 = vmatpush.bf16.msra.mxu3 %v351_v2  ;;  %v912_v2 = vpop.permute.xlu1 %911 }
 0x134   :  { %509 = vmatpush.bf16.msra.mxu1 %v350_v60  ;;  %894 = vmatpush.bf16.msra.mxu3 %v350_v60  ;;  %v902_v46 = vpop.permute.xlu2 %901 }
 0x135   :  { %v904_v49 = vunpack.i.h.bf16 %v902_v46  ;;  %v903_v55 = vunpack.i.l.bf16 %v902_v46 }
 0x137   :  { %510 = vmatmul.bf16.vlgmr.msra.gmra.mxu1 %v832_v62  ;;  %535 = vmatmul.bf16.vlgmr.msra.gmra.mxu3 %v837_v56 }
 0x147   :  { %515 = vmatmul.bf16.gmra.mxu1 %v833_v3  ;;  %540 = vmatmul.bf16.gmra.mxu3 %v838_v4  ;;  %v913_v3 = vunpack.i.l.bf16 %v912_v2 }
 0x157   :  { %520 = vmatmul.bf16.gmra.mxu1 %v834_v5  ;;  %545 = vmatmul.bf16.gmra.mxu3 %v839_v6 }
 0x167   :  { %525 = vmatmul.bf16.gmra.mxu1 %v835_v7 }
 0x177   :  { %530 = vmatmul.bf16.gmra.mxu1 %v836_v8 }
 0x1b4   :  { %v511_v9 = vpop.f32.mrf.mxu1 }
 0x1b5   :  { %v512_v35 = vadd.f32 %v511_v9, %v377_v10  ;;  %v914_v10 = vunpack.i.h.bf16 %v912_v2 }
 0x1b7   :  { %v551_v40 = vmul.f32 0.01, %v512_v35 }
 0x1b9   :  { %v567_v50 = vmax.f32 %v512_v35, %v551_v40 }
 0x1ba   :  { %v536_v20 = vpop.f32.mrf.mxu3 }
 0x1bb   :  { %v695_v0 = vmul.f32 %v903_v55, %v567_v50 }
 0x1bc   :  { %v513_v12 = vpop.f32.mrf.mxu1 }
 0x1bd   :  { %v514_v32 = vadd.f32 %v513_v12, %v382_v11 }
 0x1bf   :  { %v552_v37 = vmul.f32 0.01, %v514_v32 }
 0x1c1   :  { %v568_v43 = vmax.f32 %v514_v32, %v552_v37  ;;  %v922_v32 = vpop.permute.xlu0 %921 }
 0x1c2   :  { %v538_v25 = vpop.f32.mrf.mxu3 }
 0x1c3   :  { %v696_v57 = vmul.f32 %v904_v49, %v568_v43 }
 0x1c4   :  { %v516_v15 = vpop.f32.mrf.mxu1 }
 0x1c5   :  { %v517_v36 = vadd.f32 %v516_v15, %v387_v13  ;;  %v711_v4 = vadd.f32 %v696_v57, %v695_v0 }
 0x1c7   :  { %v553_v41 = vmul.f32 0.01, %v517_v36 }
 0x1c9   :  { %v569_v51 = vmax.f32 %v517_v36, %v553_v41 }
 0x1ca   :  { %v1248_v30 = vpop.f32.mrf.mxu3 }
 0x1cb   :  { %v697_v60 = vmul.f32 %v908_v58, %v569_v51  ;;  %v542_v41 = vadd.f32 %v1248_v30, %v1246_v29 }
 0x1cc   :  { %v518_v19 = vpop.f32.mrf.mxu1 }
 0x1cd   :  { %v519_v39 = vadd.f32 %v518_v19, %v392_v14  ;;  %v712_v12 = vadd.f32 %v711_v4, %v697_v60  ;;  %v563_v51 = vmul.f32 0.01, %v542_v41 }
 0x1cf   :  { %v554_v47 = vmul.f32 0.01, %v519_v39 }
 0x1d1   :  { %v570_v59 = vmax.f32 %v519_v39, %v554_v47  ;;  %v923_v39 = vunpack.i.l.bf16 %v922_v32 }
 0x1d2   :  { %v543_v44 = vpop.f32.mrf.mxu3 }
 0x1d3   :  { %v698_v6 = vmul.f32 %v909_v1, %v570_v59  ;;  %v544_v46 = vadd.f32 %v543_v44, %v1250_v31 }
 0x1d4   :  { %v521_v23 = vpop.f32.mrf.mxu1 }
 0x1d5   :  { %v522_v42 = vadd.f32 %v521_v23, %v397_v16  ;;  %v917_v16 = vpop.permute.xlu2 %916  ;;  %v713_v19 = vadd.f32 %v712_v12, %v698_v6  ;;  %v564_v57 = vmul.f32 0.01, %v544_v46 }
 0x1d7   :  { %v555_v52 = vmul.f32 0.01, %v522_v42  ;;  %v580_v60 = vmax.f32 %v544_v46, %v564_v57 }
 0x1d9   :  { %v571_v62 = vmax.f32 %v522_v42, %v555_v52 }
 0x1da   :  { %v546_v11 = vpop.f32.mrf.mxu3 }
 0x1db   :  { %v699_v13 = vmul.f32 %v913_v3, %v571_v62  ;;  %v547_v52 = vadd.f32 %v546_v11, %v1252_v34 }
 0x1dc   :  { %v523_v28 = vpop.f32.mrf.mxu1 }
 0x1dd   :  { %v524_v48 = vadd.f32 %v523_v28, %v402_v17  ;;  %v537_v17 = vadd.f32 %v536_v20, %v427_v26  ;;  %v539_v28 = vadd.f32 %v538_v25, %v432_v27  ;;  %v714_v35 = vadd.f32 %v713_v19, %v699_v13  ;;  %v932_v55 = vpop.permute.xlu2 %931 }
 0x1de   :  { %v933_v1 = vunpack.i.l.bf16 %v932_v55  ;;  %v934_v3 = vunpack.i.h.bf16 %v932_v55 }
 0x1df   :  { %v556_v61 = vmul.f32 0.01, %v524_v48  ;;  %v562_v26 = vmul.f32 0.01, %v539_v28 }
 0x1e1   :  { %v572_v7 = vmax.f32 %v524_v48, %v556_v61  ;;  %v924_v48 = vunpack.i.h.bf16 %v922_v32  ;;  %v578_v30 = vmax.f32 %v539_v28, %v562_v26  ;;  %v579_v61 = vmax.f32 %v542_v41, %v563_v51 }
 0x1e2   :  { %v548_v50 = vpop.f32.mrf.mxu3 }
 0x1e3   :  { %v707_v4 = vmul.f32 %v933_v1, %v579_v61 }
 0x1e4   :  { %v526_v33 = vpop.f32.mrf.mxu1 }
 0x1e5   :  { %v527_v53 = vadd.f32 %v526_v33, %v407_v18  ;;  %v918_v18 = vunpack.i.l.bf16 %v917_v16  ;;  %v919_v33 = vunpack.i.h.bf16 %v917_v16 }
 0x1e7   :  { %v557_v56 = vmul.f32 0.01, %v527_v53 }
 0x1e9   :  { %v573_v14 = vmax.f32 %v527_v53, %v557_v56  ;;  %v937_v56 = vpop.permute.xlu0 %936 }
 0x1eb   :  { %v701_v36 = vmul.f32 %v918_v18, %v573_v14 }
 0x1ec   :  { %v528_v45 = vpop.f32.mrf.mxu1 }
 0x1ed   :  { %v529_v63 = vadd.f32 %v528_v45, %v412_v21  ;;  %v700_v21 = vmul.f32 %v914_v10, %v572_v7  ;;  %v927_v45 = vpop.permute.xlu1 %926  ;;  %v938_v7 = vunpack.i.l.bf16 %v937_v56  ;;  %v939_v10 = vunpack.i.h.bf16 %v937_v56 }
 0x1ee   :  { %v928_v29 = vunpack.i.l.bf16 %v927_v45  ;;  %v929_v31 = vunpack.i.h.bf16 %v927_v45 }
 0x1ef   :  { %v558_v8 = vmul.f32 0.01, %v529_v63  ;;  %v715_v42 = vadd.f32 %v714_v35, %v700_v21 }
 0x1f0   :  { %v706_v2 = vmul.f32 %v929_v31, %v578_v30 }
 0x1f1   :  { %v574_v23 = vmax.f32 %v529_v63, %v558_v8  ;;  %v716_v25 = vadd.f32 %v715_v42, %v701_v36  ;;  %v565_v63 = vmul.f32 0.01, %v547_v52  ;;  %v708_v8 = vmul.f32 %v934_v3, %v580_v60 }
 0x1f3   :  { %v702_v43 = vmul.f32 %v919_v33, %v574_v23  ;;  %v733_v23 = vstv %s1274_s6 }
 0x1f4   :  { %v531_v5 = vpop.f32.mrf.mxu1 }
 0x1f5   :  { %v532_v9 = vadd.f32 %v531_v5, %v417_v22  ;;  %v561_v22 = vmul.f32 0.01, %v537_v17  ;;  %v717_v53 = vadd.f32 %v716_v25, %v702_v43  ;;  %v581_v5 = vmax.f32 %v547_v52, %v565_v63 }
 0x1f7   :  { %v559_v15 = vmul.f32 0.01, %v532_v9  ;;  %v577_v49 = vmax.f32 %v537_v17, %v561_v22  ;;  %v709_v11 = vmul.f32 %v938_v7, %v581_v5 }
 0x1f9   :  { %v575_v37 = vmax.f32 %v532_v9, %v559_v15  ;;  %v705_v44 = vmul.f32 %v928_v29, %v577_v49 }
 0x1fb   :  { %v703_v27 = vmul.f32 %v923_v39, %v575_v37 }
 0x1fc   :  { %v533_v40 = vpop.f32.mrf.mxu1 }
 0x1fd   :  { %v534_v20 = vadd.f32 %v533_v40, %v1244_v24  ;;  %v549_v24 = vadd.f32 %v548_v50, %v1254_v38  ;;  %v718_v58 = vadd.f32 %v717_v53, %v703_v27 }
 0x1ff   :  { %v560_v47 = vmul.f32 0.01, %v534_v20  ;;  %v566_v62 = vmul.f32 0.01, %v549_v24 }
 0x201   :  { %v576_v54 = vmax.f32 %v534_v20, %v560_v47  ;;  %v582_v38 = vmax.f32 %v549_v24, %v566_v62 }
 0x203   :  { %v704_v59 = vmul.f32 %v924_v48, %v576_v54  ;;  %v710_v13 = vmul.f32 %v939_v10, %v582_v38 }
 0x205   :  { %v719_v0 = vadd.f32 %v718_v58, %v704_v59 }
 0x207   :  { %v720_v34 = vadd.f32 %v719_v0, %v705_v44 }
 0x209   :  { %v721_v6 = vadd.f32 %v720_v34, %v706_v2 }
 0x20b   :  { %v722_v9 = vadd.f32 %v721_v6, %v707_v4 }
 0x20d   :  { %v723_v12 = vadd.f32 %v722_v9, %v708_v8 }
 0x20f   :  { %v724_v14 = vadd.f32 %v723_v12, %v709_v11 }
 0x211   :  { %v725_v15 = vadd.f32 %v724_v14, %v710_v13 }
 0x213   :  { %v726_v16 = vrot.slane %v725_v15, 4 }
 0x215   :  { %v727_v17 = vadd.f32 %v726_v16, %v725_v15 }
 0x217   :  { %v728_v18 = vrot.slane %v727_v17, 2 }
 0x219   :  { %v729_v19 = vadd.f32 %v728_v18, %v727_v17 }
 0x21b   :  { %v730_v21 = vrot.slane %v729_v19, 1 }
 0x21d   :  { %v731_v28 = vadd.f32 %v730_v21, %v729_v19 }
 0x21f   :  { %v734_v32 = vadd.f32 %v733_v23, %v731_v28 }
 0x221   :  { %735 = vst [vmem:[#allocation3] sm:$0x1] %v734_v32 }
 0x222   :  { %746 = dma.vmem_to_hbm [thread:$0]  %s742_s22, 16, %s744_s25, [#allocation4]  }
 0x223   :  { %964 = dma.done.wait [#allocation4], 16  }
 0x224   :  { %965 = vsyncadd [#allocation4], 4294967280 }
 0x225   :  { %751 = vsyncpa [#allocation4], 1 }

</bundles_post_ra>
